<compile_context>
chip_gen: v5e
topology: v5e:2x2
jax: 0.10.0
libtpu: 0.0.40
codegen_flags: <defaults>
</compile_context>

<pallas_src>
import math

import jax
import jax.numpy as jnp
from jax.experimental import pallas as pl
from jax.experimental.pallas import tpu as pltpu


def pe_add_kernel(x_ref, pe_ref, o_ref):
    """x_ref: (tr, tc), pe_ref: (1, tc) broadcast over rows, o_ref: (tr, tc)."""
    o_ref[...] = x_ref[...] + pe_ref[...]


def _vmem_capacity_bytes():
    try:
        return int(pltpu.get_tpu_info().vmem_capacity_bytes)
    except Exception:
        return 64 << 20  # conservative fallback (v7x per-TC VMEM)


def _choose_tiles(n_rows, n_cols, itemsize, target_bytes):
    """Pick a (tile_rows, tile_cols) block for a (n_rows, n_cols) array.

    Legality: each trailing block dim is either a multiple of the sublane/lane
    minimum (8|16|32, 128) or equal to the full array dim; partial final
    blocks from cdiv grids are masked by Pallas.
    """
    sub = max(8, 32 // itemsize)   # 8 (f32), 16 (bf16), 32 (int8)
    lane = 128
    row_bytes = n_cols * itemsize

    if n_cols <= lane or sub * row_bytes <= target_bytes:
        # Keep whole rows: tile_cols == full n_cols is always legal.
        tc = n_cols
        tr = max(sub, (target_bytes // max(row_bytes, 1)) // sub * sub)
        if tr >= n_rows:
            tr = n_rows            # full dim -> legal for any n_rows
    else:
        # One sublane group of rows is already big: tile the feature axis too.
        tr = n_rows if n_rows < sub else sub
        tc = max(lane, (target_bytes // max(tr * itemsize, 1)) // lane * lane)
        if tc >= n_cols:
            tc = n_cols
    return tr, tc


def positional_encoding_forward(x, pe):
    """x: (N, C, T, V); pe: (C, time_len, V) with time_len >= T."""
    N, C, T, V = x.shape
    CL = C * T * V
    itemsize = jnp.dtype(x.dtype).itemsize

    # pe.to(x.dtype)[:, :, :T] -- tiny constant, sliced / cast once here.
    pe_flat = pe[:, :T, :].astype(x.dtype).reshape(1, CL)
    x_flat = x.reshape(N, CL)      # contiguous reshape: no data movement

    vmem_cap = _vmem_capacity_bytes()
    # ~vmem/16 per block keeps 4 live x/out buffers + pe well under physical VMEM
    # on every generation (8 MiB on v5e/v6e, 4 MiB on v7x).
    target_bytes = int(min(8 << 20, max(1 << 20, vmem_cap // 16)))
    tr, tc = _choose_tiles(N, CL, itemsize, target_bytes)

    block_bytes = tr * tc * itemsize
    vmem_limit = 4 * block_bytes + 2 * tc * itemsize + (8 << 20)
    vmem_limit = int(max(16 << 20, min(vmem_cap - (4 << 20), vmem_limit)))

    grid = (pl.cdiv(N, tr), pl.cdiv(CL, tc))

    cost = pl.CostEstimate(
        flops=N * CL,
        transcendentals=0,
        bytes_accessed=(2 * N * CL + CL) * itemsize,
    )

    out = pl.pallas_call(
        pe_add_kernel,
        out_shape=jax.ShapeDtypeStruct((N, CL), x.dtype),
        grid_spec=pltpu.PrefetchScalarGridSpec(
            num_scalar_prefetch=0,
            grid=grid,
            in_specs=[
                pl.BlockSpec((tr, tc), lambda i, j: (i, j)),   # x slab
                pl.BlockSpec((1, tc), lambda i, j: (0, j)),    # pe, row-resident
            ],
            out_specs=pl.BlockSpec((tr, tc), lambda i, j: (i, j)),
        ),
        compiler_params=pltpu.CompilerParams(
            dimension_semantics=("parallel", "parallel"),
            vmem_limit_bytes=vmem_limit,
        ),
        cost_estimate=cost,
    )(x_flat, pe_flat)

    return out.reshape(N, C, T, V)


def build_positional_encoding(channel, joint_num, time_len):
    """JAX mirror of the PyTorch buffer construction. Returns pe of shape (C, time_len, V)."""
    # position[t*V + j] = j  (joint index, repeated for every time step)
    position = jnp.tile(jnp.arange(joint_num, dtype=jnp.float32), time_len)[:, None]
    div_term = jnp.exp(jnp.arange(0, channel, 2, dtype=jnp.float32)
                       * -(math.log(10000.0) / channel))
    pe = jnp.zeros((time_len * joint_num, channel), jnp.float32)
    pe = pe.at[:, 0::2].set(jnp.sin(position * div_term))
    pe = pe.at[:, 1::2].set(jnp.cos(position * div_term))
    # view(time_len, joint_num, C).permute(2, 0, 1) -> (C, time_len, V)
    return jnp.transpose(pe.reshape(time_len, joint_num, channel), (2, 0, 1))


def ref_forward(x, pe):
    """Pure-JAX reference mirroring the PyTorch forward."""
    T = x.shape[2]
    return x + pe[None, :, :T, :].astype(x.dtype)


if __name__ == "__main__":
    # small shapes: batch N=2, channel C=4, joint_num V=16, buffer time_len=16, x uses T=8
    N, C, T, V, TIME_LEN = 2, 4, 8, 16, 16

    pe = build_positional_encoding(channel=C, joint_num=V, time_len=TIME_LEN)
    x = jax.random.normal(jax.random.PRNGKey(0), (N, C, T, V), jnp.float32)

    y = positional_encoding_forward(x, pe)
    y = jax.block_until_ready(y)

    y_ref = ref_forward(x, pe)

    assert y.shape == (N, C, T, V), y.shape
    assert jnp.allclose(y, y_ref, rtol=1e-6, atol=1e-6), float(jnp.max(jnp.abs(y - y_ref)))
    print("KERNEL_OK")
</pallas_src>

<mosaic_0001>
module attributes {stable_mosaic.version = 11 : i64} {
  func.func @pe_add_kernel(%arg0: i32, %arg1: i32, %arg2: memref<2x512xf32, #tpu.memory_space<vmem>>, %arg3: memref<1x512xf32, #tpu.memory_space<vmem>>, %arg4: memref<2x512xf32, #tpu.memory_space<vmem>>) attributes {dimension_semantics = [#tpu.dimension_semantics<parallel>, #tpu.dimension_semantics<parallel>], iteration_bounds = array<i64: 1, 1>, scalar_prefetch = 0 : i64, scratch_operands = 0 : i64, tpu.core_type = #tpu.core_type<tc>, window_params = [{transform_indices = @transform_0, window_bounds = array<i64: 2, 512>}, {transform_indices = @transform_1, window_bounds = array<i64: 1, 512>}, {transform_indices = @transform_2, window_bounds = array<i64: 2, 512>}]} {
    %c0 = arith.constant 0 : index
    %c0_0 = arith.constant 0 : index
    %0 = vector.load %arg2[%c0, %c0_0] : memref<2x512xf32, #tpu.memory_space<vmem>>, vector<2x512xf32>
    %c0_1 = arith.constant 0 : index
    %c0_2 = arith.constant 0 : index
    %1 = vector.load %arg3[%c0_1, %c0_2] : memref<1x512xf32, #tpu.memory_space<vmem>>, vector<1x512xf32>
    %2 = vector.broadcast %1 : vector<1x512xf32> to vector<2x512xf32>
    %3 = arith.addf %0, %2 : vector<2x512xf32>
    %c0_3 = arith.constant 0 : index
    %c0_4 = arith.constant 0 : index
    %4 = vector.load %arg4[%c0_3, %c0_4] : memref<2x512xf32, #tpu.memory_space<vmem>>, vector<2x512xf32>
    tpu.vector_store %arg4[%c0_3, %c0_4], %3 {strides = array<i32>} : memref<2x512xf32, #tpu.memory_space<vmem>>, vector<2x512xf32>,
    return
  }
  func.func @transform_0(%arg0: i32, %arg1: i32) -> (i32, i32) {
    %c0_i32 = arith.constant 0 : i32
    return %arg0, %arg1 : i32, i32
  }
  func.func @transform_1(%arg0: i32, %arg1: i32) -> (i32, i32) {
    %c0_i32 = arith.constant 0 : i32
    %c0_i32_0 = arith.constant 0 : i32
    return %c0_i32, %arg1 : i32, i32
  }
  func.func @transform_2(%arg0: i32, %arg1: i32) -> (i32, i32) {
    %c0_i32 = arith.constant 0 : i32
    return %arg0, %arg1 : i32, i32
  }
}

</mosaic_0001>

<bundles_post_ra>
// kernel: tpu_custom_call.1
= control target key start
LH: loop header
LB: loop body
LE: loop exit
PB: predicated region body
PF: predicated region fallthrough
CT: control target
= control target key end

     0   :  { %7 = vsyncpa [#allocation3], 0  ;;  %s185_s0 = inlined_call_operand.hbm [shape: f32[2,512], index: 0, kind: input, shape index: {}]   ;;  %s186_s1 = inlined_call_operand.hbm [shape: f32[1,512], index: 1, kind: input, shape index: {}]   ;;  %s187_s2 = inlined_call_operand.hbm [shape: f32[2,512], index: 2, kind: output, shape index: {}]  }
   0x1   :  { %8 = vsyncpa [#allocation6], 0 }
   0x2   :  { %9 = vsyncpa [#allocation4], 0  ;;  %s15_s11 = sshll.u32 %s185_s0, 4  ;;  %s158_s12 = smov [#allocation2]   ;;  %s16_s11 = int_to_ptr.hbm [resolvable:$true] %s15_s11 }
   0x3   :  { %s17_s13 = sshll.u32 %s158_s12, 4  ;;  %s26_s16 = sshll.u32 %s186_s1, 4  ;;  %s18_s13 = int_to_ptr.vmem [resolvable:$true] %s17_s13  ;;  %s27_s16 = int_to_ptr.hbm [resolvable:$true] %s26_s16 }
   0x4   :  { %20 = dma.hbm_to_vmem [thread:$0]  %s16_s11, 128, %s18_s13, [#allocation3]  }
   0x5   :  { %s159_s17 = smov [#allocation5]  }
   0x6   :  { %s28_s18 = sshll.u32 %s159_s17, 4  ;;  %s29_s18 = int_to_ptr.vmem [resolvable:$true] %s28_s18 }
   0x7   :  { %31 = dma.hbm_to_vmem [thread:$0]  %s27_s16, 64, %s29_s18, [#allocation6]  }
   0x8   :  { %152 = dma.done.wait [#allocation3], 128  }
   0x9   :  { %153 = vsyncadd [#allocation3], 4294967168 }
   0xa   :  { %154 = dma.done.wait [#allocation6], 64  }
   0xb   :  { %155 = vsyncadd [#allocation6], 4294967232  ;;  %v41_v0 = vld [vmem:[#allocation5] sm:$0xf]  ;;  %vm50_vm0 = vcmask 1041408   ;;  %vm52_vm1 = vcmask 1045508  }
   0xc   :  { %v43_v1 = vperm.slane %v41_v0, 0  ;;  %v44_v2 = vperm.slane %v41_v0, 1  ;;  %v45_v3 = vperm.slane %v41_v0, 2  ;;  %v46_v4 = vperm.slane %v41_v0, 3  ;;  %v40_v8 = vld [vmem:[#allocation2] sm:$0xff]  ;;  %s160_s0 = smov [#allocation7]  }
   0xd   :  { %vm54_vm2 = vcmask 1043456   ;;  %s64_s1 = sshll.u32 %s160_s0, 4  ;;  %s66_s21 = sshll.u32 %s187_s2, 4  ;;  %s65_s1 = int_to_ptr.vmem [resolvable:$true] %s64_s1  ;;  %s67_s21 = int_to_ptr.hbm [resolvable:$true] %s66_s21 }
   0xe   :  { %v47_v5 = vrot.slane %v44_v2, 6  ;;  %v48_v6 = vrot.slane %v45_v3, 4  ;;  %v49_v7 = vrot.slane %v46_v4, 2 }
  0x10   :  { %v51_v9 = vsel %vm50_vm0, %v43_v1, %v47_v5  ;;  %v53_v10 = vsel %vm52_vm1, %v48_v6, %v49_v7 }
  0x11   :  { %v55_v11 = vsel %vm54_vm2, %v51_v9, %v53_v10 }
  0x12   :  { %v57_v12 = vadd.f32 %v55_v11, %v40_v8 }
  0x14   :  { %58 = vst [vmem:[#allocation7] sm:$0xff] %v57_v12 }
  0x15   :  { %69 = dma.vmem_to_hbm [thread:$0]  %s65_s1, 128, %s67_s21, [#allocation4]  }
  0x16   :  { %156 = dma.done.wait [#allocation4], 128  }
  0x17   :  { %157 = vsyncadd [#allocation4], 4294967168 }
  0x18   :  { %74 = vsyncpa [#allocation3], 1 }
  0x19   :  { %75 = vsyncpa [#allocation6], 1 }
  0x1a   :  { %76 = vsyncpa [#allocation4], 1 }

</bundles_post_ra>
